<compile_context>
chip_gen: v7x
topology: tpu7x:2x2x1
jax: 0.10.0
libtpu: 0.0.40
codegen_flags: <defaults>
</compile_context>

<pallas_src>
import functools
import math

import jax
import jax.numpy as jnp
from jax.experimental import pallas as pl
from jax.experimental.pallas import tpu as pltpu


_INV_SQRT2 = 1.0 / math.sqrt(2.0)
_SQRT_2_OVER_PI = math.sqrt(2.0 / math.pi)


def _gelu(x, approx_tanh=False):
    if approx_tanh:
        # tanh approximation: transcendental goes to the (otherwise idle) EUP slot.
        # Slightly different numerics than torch.nn.GELU() default -- opt-in only.
        return 0.5 * x * (1.0 + jnp.tanh(_SQRT_2_OVER_PI * (x + 0.044715 * x * x * x)))
    # Exact (erf-based) GELU, matching torch.nn.GELU() default.
    return 0.5 * x * (1.0 + jax.lax.erf(x * _INV_SQRT2))


def ctmlp_kernel(x_ref, w1_ref, b1_ref, w2_ref, b2_ref, o_ref, acc_ref, *,
                 approx_gelu: bool):
    """One (M-tile, H-tile) grid step: partial Linear->GELU->Linear, accumulated over H."""
    h_idx = pl.program_id(1)

    @pl.when(h_idx == 0)
    def _():
        acc_ref[...] = jnp.zeros_like(acc_ref)

    # In-kernel bf16 cast of the activation tile (VPU filler hidden under the MXU);
    # avoids a separate full-HBM cast pass in the wrapper.
    x = x_ref[...].astype(jnp.bfloat16)                                # [TM, D]
    t = jnp.dot(x, w1_ref[...], preferred_element_type=jnp.float32)    # [TM, TH] f32
    t = _gelu(t + b1_ref[...], approx_gelu)                            # bias + GELU in f32
    acc_ref[...] += jnp.dot(t.astype(jnp.bfloat16), w2_ref[...],
                            preferred_element_type=jnp.float32)        # [TM, D] f32

    @pl.when(h_idx == pl.num_programs(1) - 1)
    def _():
        # Dropout: eval-mode identity (torch.nn.Dropout is a no-op at inference).
        # TODO(synk): training-mode dropout would need pltpu.prng_seed + prng_random_bits mask.
        o_ref[...] = (acc_ref[...] + b2_ref[...]).astype(o_ref.dtype)


def prepare_ctmlp_params(w1, b1, w2, b2):
    """One-time parameter prep (bf16 weights, 2-D f32 biases).

    Call this once at init / outside the per-step forward so the per-call path
    does not pay an extra HBM cast pass over the weight matrices.
    """
    return (jnp.asarray(w1, jnp.bfloat16),
            jnp.asarray(b1, jnp.float32).reshape(1, -1),
            jnp.asarray(w2, jnp.bfloat16),
            jnp.asarray(b2, jnp.float32).reshape(1, -1))


def _footprint_bytes(tm, th, d):
    """Approximate VMEM footprint of one grid step (double-buffered I/O)."""
    x_io = 2 * (tm * d * 4) * 2            # x + out tiles (f32), 2 buffers each
    wts = 2 * (2 * d * th * 2)             # w1 + w2 blocks (bf16), 2 buffers each
    bias = 2 * (th + d) * 4 * 2
    acc = tm * d * 4                       # accumulator scratch
    inter = tm * th * 4                    # f32 GELU intermediate
    return x_io + wts + bias + acc + inter


def _choose_tile_m(m, tile_m):
    """Largest tile <= tile_m that divides M (multiple of 8), or 0 if none."""
    if m <= tile_m:
        return m                           # single full-extent tile
    start = tile_m - (tile_m % 8)
    for tm in range(start, 7, -8):
        if m % tm == 0:
            return tm
    return 0


def _choose_tile_h(h, d, tm, budget_bytes=40 << 20):
    """Largest hidden tile (multiple of 128 dividing H) that fits the VMEM budget."""
    if h % 128 != 0:
        return h                           # small / odd hidden dims: keep whole H
    cands = [th for th in range(128, h + 1, 128) if h % th == 0]
    for th in reversed(cands):
        if _footprint_bytes(tm, th, d) <= budget_bytes:
            return th
    return cands[0]


def ctmlp_forward(x, w1, b1, w2, b2, *, tile_m=512, tile_h=None,
                  out_dtype=None, approx_gelu=False, vmem_limit_bytes=None):
    """Fused Linear -> GELU -> Linear (-> eval-mode Dropout no-op).

    x : [B, T, D] float32
    w1: [D, H] (transposed vs. PyTorch), b1: [H] or [1, H]
    w2: [H, D] (transposed vs. PyTorch), b2: [D] or [1, D]
    Pass params through prepare_ctmlp_params() once to avoid per-call casts.
    Returns [B, T, D] in out_dtype (default: x.dtype).
    """
    B, T, D = x.shape
    M = B * T
    H = w1.shape[1]
    out_dtype = x.dtype if out_dtype is None else out_dtype

    # Only cast if the caller did not pre-prepare params (these are no-ops otherwise).
    if w1.dtype != jnp.bfloat16:
        w1 = w1.astype(jnp.bfloat16)
    if w2.dtype != jnp.bfloat16:
        w2 = w2.astype(jnp.bfloat16)
    b1 = jnp.asarray(b1, jnp.float32).reshape(1, H)
    b2 = jnp.asarray(b2, jnp.float32).reshape(1, D)

    # --- token-axis tiling (no pad/slice passes unless unavoidable) -----------
    tm = _choose_tile_m(M, tile_m)
    x2 = x.reshape(M, D)
    m_pad = M
    if tm == 0:
        # Fallback: M has no clean divisor <= tile_m. Zero-pad (padded rows are
        # computed on zeros -- finite -- and sliced off afterwards).
        tm = max(8, tile_m - (tile_m % 8))
        m_pad = pl.cdiv(M, tm) * tm
        x2 = jnp.pad(x2, ((0, m_pad - M), (0, 0)))
    n_m = m_pad // tm

    # --- hidden-axis tiling ----------------------------------------------------
    th = _choose_tile_h(H, D, tm) if tile_h is None else tile_h
    assert H % th == 0 and (th == H or th % 128 == 0), "tile_h must divide H (multiple of 128)"
    n_h = H // th

    # --- VMEM limit: footprint-derived, capped below v7x's 64 MiB/TC ----------
    need = _footprint_bytes(tm, th, D)
    if vmem_limit_bytes is None:
        vmem_limit_bytes = min(max(2 * need, 32 << 20), 56 << 20)
        vmem_limit_bytes = max(vmem_limit_bytes, need + (4 << 20))

    out_itemsize = jnp.dtype(out_dtype).itemsize
    weight_bytes = 2 * D * H * 2 * (n_m if n_h > 1 else 1)   # streamed vs resident
    cost = pl.CostEstimate(
        flops=4 * m_pad * D * H,                 # two [M,D]x[D,H]-sized matmuls
        transcendentals=m_pad * H,               # GELU over the [M, H] intermediate
        bytes_accessed=m_pad * D * 4 + weight_bytes + (H + D) * 4
        + m_pad * D * out_itemsize,
    )

    out = pl.pallas_call(
        functools.partial(ctmlp_kernel, approx_gelu=approx_gelu),
        out_shape=jax.ShapeDtypeStruct((m_pad, D), out_dtype),
        grid_spec=pltpu.PrefetchScalarGridSpec(
            num_scalar_prefetch=0,
            grid=(n_m, n_h),
            in_specs=[
                pl.BlockSpec((tm, D), lambda i, h: (i, 0)),   # x tile: resident across h
                pl.BlockSpec((D, th), lambda i, h: (0, h)),   # w1: streamed over h
                pl.BlockSpec((1, th), lambda i, h: (0, h)),   # b1: streamed over h
                pl.BlockSpec((th, D), lambda i, h: (h, 0)),   # w2: streamed over h
                pl.BlockSpec((1, D), lambda i, h: (0, 0)),    # b2: resident
            ],
            out_specs=pl.BlockSpec((tm, D), lambda i, h: (i, 0)),
            scratch_shapes=[pltpu.VMEM((tm, D), jnp.float32)],
        ),
        compiler_params=pltpu.CompilerParams(
            dimension_semantics=("parallel", "arbitrary"),    # M megacore-shardable, H reduction
            vmem_limit_bytes=int(vmem_limit_bytes),
        ),
        cost_estimate=cost,
    )(x2, w1, b1, w2, b2)

    if m_pad != M:
        out = out[:M]
    return out.reshape(B, T, D)


def ctmlp_reference(x, w1, b1, w2, b2, *, matmul_dtype=jnp.float32):
    """Pure-JAX reference. matmul_dtype=bfloat16 mirrors the kernel's MXU casts."""
    b1 = jnp.asarray(b1, jnp.float32).reshape(-1)
    b2 = jnp.asarray(b2, jnp.float32).reshape(-1)
    h = jnp.dot(x.astype(matmul_dtype), jnp.asarray(w1).astype(matmul_dtype),
                preferred_element_type=jnp.float32) + b1
    h = 0.5 * h * (1.0 + jax.lax.erf(h * _INV_SQRT2))
    y = jnp.dot(h.astype(matmul_dtype), jnp.asarray(w2).astype(matmul_dtype),
                preferred_element_type=jnp.float32) + b2
    return y


if __name__ == "__main__":
    # Config consistent with the module: n_embd=32, hidden=4*32=128, bias=True,
    # resid_pdrop dropout is identity in eval mode.
    B, T, D = 2, 8, 32
    H = 4 * D

    key = jax.random.PRNGKey(0)
    kx, kw1, kb1, kw2, kb2 = jax.random.split(key, 5)

    x = jax.random.normal(kx, (B, T, D), dtype=jnp.float32)
    # Deterministic "Linear-like" init (scaled uniform), stored transposed vs. PyTorch.
    w1 = jax.random.uniform(kw1, (D, H), jnp.float32, -1.0, 1.0) / math.sqrt(D)
    b1 = jax.random.uniform(kb1, (H,), jnp.float32, -1.0, 1.0) / math.sqrt(D)
    w2 = jax.random.uniform(kw2, (H, D), jnp.float32, -1.0, 1.0) / math.sqrt(H)
    b2 = jax.random.uniform(kb2, (D,), jnp.float32, -1.0, 1.0) / math.sqrt(H)

    # One-time param prep (bf16 weights / 2-D f32 biases), hoisted out of the forward.
    w1_p, b1_p, w2_p, b2_p = prepare_ctmlp_params(w1, b1, w2, b2)

    out = ctmlp_forward(x, w1_p, b1_p, w2_p, b2_p)
    out = jax.block_until_ready(out)
    assert out.shape == (B, T, D)

    # Tight check vs. a reference that mirrors the kernel's bf16-operand /
    # f32-accumulate matmuls (validates the kernel itself).
    ref_bf16 = ctmlp_reference(x, w1, b1, w2, b2, matmul_dtype=jnp.bfloat16)
    assert jnp.allclose(out, ref_bf16, atol=1e-3, rtol=1e-3), "mismatch vs bf16-matched reference"

    # Looser check vs. the full-f32 reference (bf16 operand rounding only).
    ref_f32 = ctmlp_reference(x, w1, b1, w2, b2, matmul_dtype=jnp.float32)
    assert jnp.allclose(out, ref_f32, atol=5e-2, rtol=5e-2), "mismatch vs f32 reference"

    print("KERNEL_OK")
</pallas_src>

<mosaic_0001>
module attributes {stable_mosaic.version = 11 : i64} {
  func.func @ctmlp_kernel(%arg0: i32, %arg1: i32, %arg2: memref<16x32xf32, #tpu.memory_space<vmem>>, %arg3: memref<32x128xbf16, #tpu.memory_space<vmem>>, %arg4: memref<1x128xf32, #tpu.memory_space<vmem>>, %arg5: memref<128x32xbf16, #tpu.memory_space<vmem>>, %arg6: memref<1x32xf32, #tpu.memory_space<vmem>>, %arg7: memref<16x32xf32, #tpu.memory_space<vmem>>, %arg8: memref<16x32xf32, #tpu.memory_space<vmem>>) attributes {dimension_semantics = [#tpu.dimension_semantics<parallel>, #tpu.dimension_semantics<arbitrary>], iteration_bounds = array<i64: 1, 1>, scalar_prefetch = 0 : i64, scratch_operands = 1 : i64, tpu.core_type = #tpu.core_type<tc>, window_params = [{transform_indices = @transform_0, window_bounds = array<i64: 16, 32>}, {transform_indices = @transform_1, window_bounds = array<i64: 32, 128>}, {transform_indices = @transform_2, window_bounds = array<i64: 1, 128>}, {transform_indices = @transform_3, window_bounds = array<i64: 128, 32>}, {pipeline_mode = #tpu.pipeline_mode<synchronous>, transform_indices = @transform_4, window_bounds = array<i64: 1, 32>}, {transform_indices = @transform_5, window_bounds = array<i64: 16, 32>}]} {
    %c0_i32 = arith.constant 0 : i32
    %0 = arith.cmpi eq, %arg1, %c0_i32 : i32
    %1 = arith.extui %0 : i1 to i32
    %c0_i32_0 = arith.constant 0 : i32
    %2 = arith.cmpi ne, %1, %c0_i32_0 : i32
    scf.if %2 {
      %cst_18 = arith.constant 0.000000e+00 : f32
      %27 = vector.broadcast %cst_18 : f32 to vector<16x32xf32>
      %c0_19 = arith.constant 0 : index
      %c0_20 = arith.constant 0 : index
      %28 = vector.load %arg8[%c0_19, %c0_20] : memref<16x32xf32, #tpu.memory_space<vmem>>, vector<16x32xf32>
      tpu.vector_store %arg8[%c0_19, %c0_20], %27 {strides = array<i32>} : memref<16x32xf32, #tpu.memory_space<vmem>>, vector<16x32xf32>,
    } else {
    }
    %c0 = arith.constant 0 : index
    %c0_1 = arith.constant 0 : index
    %3 = vector.load %arg2[%c0, %c0_1] : memref<16x32xf32, #tpu.memory_space<vmem>>, vector<16x32xf32>
    %4 = arith.truncf %3 : vector<16x32xf32> to vector<16x32xbf16>
    %c0_2 = arith.constant 0 : index
    %c0_3 = arith.constant 0 : index
    %5 = vector.load %arg3[%c0_2, %c0_3] : memref<32x128xbf16, #tpu.memory_space<vmem>>, vector<32x128xbf16>
    %cst = arith.constant dense<0.000000e+00> : vector<16x128xf32>
    %6 = tpu.matmul %4, %5, %cst {dimension_numbers = #tpu.dot_dimension_numbers<[1], [0], [0], [1], [0, 0, 1, 1], [], []>} : vector<16x32xbf16>, vector<32x128xbf16>, vector<16x128xf32> -> vector<16x128xf32>
    %c0_4 = arith.constant 0 : index
    %c0_5 = arith.constant 0 : index
    %7 = vector.load %arg4[%c0_4, %c0_5] : memref<1x128xf32, #tpu.memory_space<vmem>>, vector<1x128xf32>
    %8 = vector.broadcast %7 : vector<1x128xf32> to vector<16x128xf32>
    %9 = arith.addf %6, %8 : vector<16x128xf32>
    %cst_6 = arith.constant 5.000000e-01 : f32
    %10 = vector.broadcast %cst_6 : f32 to vector<16x128xf32>
    %11 = arith.mulf %10, %9 : vector<16x128xf32>
    %cst_7 = arith.constant 0.707106769 : f32
    %12 = vector.broadcast %cst_7 : f32 to vector<16x128xf32>
    %13 = arith.mulf %9, %12 : vector<16x128xf32>
    %14 = math.erf %13 : vector<16x128xf32>
    %cst_8 = arith.constant 1.000000e+00 : f32
    %15 = vector.broadcast %cst_8 : f32 to vector<16x128xf32>
    %16 = arith.addf %15, %14 : vector<16x128xf32>
    %17 = arith.mulf %11, %16 : vector<16x128xf32>
    %c0_9 = arith.constant 0 : index
    %c0_10 = arith.constant 0 : index
    %18 = vector.load %arg8[%c0_9, %c0_10] : memref<16x32xf32, #tpu.memory_space<vmem>>, vector<16x32xf32>
    %19 = arith.truncf %17 : vector<16x128xf32> to vector<16x128xbf16>
    %c0_11 = arith.constant 0 : index
    %c0_12 = arith.constant 0 : index
    %20 = vector.load %arg5[%c0_11, %c0_12] : memref<128x32xbf16, #tpu.memory_space<vmem>>, vector<128x32xbf16>
    %cst_13 = arith.constant dense<0.000000e+00> : vector<16x32xf32>
    %21 = tpu.matmul %19, %20, %cst_13 {dimension_numbers = #tpu.dot_dimension_numbers<[1], [0], [0], [1], [0, 0, 1, 1], [], []>} : vector<16x128xbf16>, vector<128x32xbf16>, vector<16x32xf32> -> vector<16x32xf32>
    %22 = arith.addf %18, %21 : vector<16x32xf32>
    %c0_14 = arith.constant 0 : index
    %c0_15 = arith.constant 0 : index
    %23 = vector.load %arg8[%c0_14, %c0_15] : memref<16x32xf32, #tpu.memory_space<vmem>>, vector<16x32xf32>
    tpu.vector_store %arg8[%c0_14, %c0_15], %22 {strides = array<i32>} : memref<16x32xf32, #tpu.memory_space<vmem>>, vector<16x32xf32>,
    %c0_i32_16 = arith.constant 0 : i32
    %24 = arith.cmpi eq, %arg1, %c0_i32_16 : i32
    %25 = arith.extui %24 : i1 to i32
    %c0_i32_17 = arith.constant 0 : i32
    %26 = arith.cmpi ne, %25, %c0_i32_17 : i32
    scf.if %26 {
      %c0_18 = arith.constant 0 : index
      %c0_19 = arith.constant 0 : index
      %27 = vector.load %arg8[%c0_18, %c0_19] : memref<16x32xf32, #tpu.memory_space<vmem>>, vector<16x32xf32>
      %c0_20 = arith.constant 0 : index
      %c0_21 = arith.constant 0 : index
      %28 = vector.load %arg6[%c0_20, %c0_21] : memref<1x32xf32, #tpu.memory_space<vmem>>, vector<1x32xf32>
      %29 = vector.broadcast %28 : vector<1x32xf32> to vector<16x32xf32>
      %30 = arith.addf %27, %29 : vector<16x32xf32>
      %c0_22 = arith.constant 0 : index
      %c0_23 = arith.constant 0 : index
      %31 = vector.load %arg7[%c0_22, %c0_23] : memref<16x32xf32, #tpu.memory_space<vmem>>, vector<16x32xf32>
      tpu.vector_store %arg7[%c0_22, %c0_23], %30 {strides = array<i32>} : memref<16x32xf32, #tpu.memory_space<vmem>>, vector<16x32xf32>,
    } else {
    }
    return
  }
  func.func @transform_0(%arg0: i32, %arg1: i32) -> (i32, i32) {
    %c0_i32 = arith.constant 0 : i32
    %c0_i32_0 = arith.constant 0 : i32
    return %arg0, %c0_i32 : i32, i32
  }
  func.func @transform_1(%arg0: i32, %arg1: i32) -> (i32, i32) {
    %c0_i32 = arith.constant 0 : i32
    %c0_i32_0 = arith.constant 0 : i32
    return %c0_i32, %arg1 : i32, i32
  }
  func.func @transform_2(%arg0: i32, %arg1: i32) -> (i32, i32) {
    %c0_i32 = arith.constant 0 : i32
    %c0_i32_0 = arith.constant 0 : i32
    return %c0_i32, %arg1 : i32, i32
  }
  func.func @transform_3(%arg0: i32, %arg1: i32) -> (i32, i32) {
    %c0_i32 = arith.constant 0 : i32
    %c0_i32_0 = arith.constant 0 : i32
    return %arg1, %c0_i32 : i32, i32
  }
  func.func @transform_4(%arg0: i32, %arg1: i32) -> (i32, i32) {
    %c0_i32 = arith.constant 0 : i32
    %c0_i32_0 = arith.constant 0 : i32
    %c0_i32_1 = arith.constant 0 : i32
    return %c0_i32, %c0_i32_0 : i32, i32
  }
  func.func @transform_5(%arg0: i32, %arg1: i32) -> (i32, i32) {
    %c0_i32 = arith.constant 0 : i32
    %c0_i32_0 = arith.constant 0 : i32
    return %arg0, %c0_i32 : i32, i32
  }
}

</mosaic_0001>

<bundles_post_ra>
// kernel: tpu_custom_call.1
= control target key start
LH: loop header
LB: loop body
LE: loop exit
PB: predicated region body
PF: predicated region fallthrough
CT: control target
= control target key end

     0   :  { %v350_v1 = vmov 0.0   ;;  %vm351_vm0 = vmmov 0   ;;  %vm26_vm1 = vcmask 261120   ;;  %s446_s0 = inlined_call_operand.vmem [shape: f32[16,32], index: 0, kind: input, shape index: {}]   ;;  %s447_s1 = inlined_call_operand.vmem [shape: bf16[32,128], index: 1, kind: input, shape index: {}]   ;;  %s448_s2 = inlined_call_operand.vmem [shape: f32[1,128], index: 2, kind: input, shape index: {}]   ;;  %s449_s3 = inlined_call_operand.vmem [shape: bf16[128,32], index: 3, kind: input, shape index: {}]   ;;  %s450_s4 = inlined_call_operand.vmem [shape: f32[1,32], index: 4, kind: input, shape index: {}]   ;;  %s451_s5 = inlined_call_operand.hbm [shape: f32[16,32], index: 5, kind: output, shape index: {}]  }
   0x1   :  { %v312_v0 = vld [vmem:[%s447_s1] sm:$0xff]   ;;  %279 = vmatprep.subr.bf16.mxu0 %v350_v1  ;;  %v313_v2 = vld [vmem:[%s447_s1 + $0x8] sm:$0xff]   ;;  %287 = vmatprep.subr.bf16.mxu1 %v350_v1  ;;  %27 = vst.msk [vmem:[#allocation2] sm:$0xff] %vm26_vm1, %v350_v1  ;;  %28 = vst.msk [vmem:[#allocation2 + $0x8] sm:$0xff] %vm26_vm1, %v350_v1 }
   0x2   :  { %280 = vmatpush3.bf16.msra.mxu0 %v312_v0  ;;  %283 = vmatprep.mubr.msk.bf16.mxu0 %vm351_vm0, %v350_v1  ;;  %v29_v3 = vld [vmem:[%s446_s0] sm:$0xff]  ;;  %v30_v4 = vld [vmem:[%s446_s0 + $0x8] sm:$0xff] }
   0x3   :  { %281 = vmatprep.subr.bf16.mxu0 %v350_v1  ;;  %v314_v5 = vld [vmem:[%s449_s3] sm:$0xff]   ;;  %303 = vmatprep.mubr.msk.bf16.mxu1 %vm351_vm0, %v350_v1  ;;  %v315_v6 = vld [vmem:[%s449_s3 + $0x8] sm:$0xff]   ;;  %v31_v7 = vpack.c.bf16 %v30_v4, %v29_v3 }
   0x4   :  { %288 = vmatpush3.bf16.msra.mxu1 %v314_v5 }
   0x5   :  { %289 = vmatprep.subr.bf16.mxu1 %v350_v1 }
   0x6   :  { %282 = vmatpush3.bf16.msra.mxu0 %v313_v2 }
   0x8   :  { %290 = vmatpush3.bf16.msra.mxu1 %v315_v6 }
   0x9   :  { %284 = vmatmul.mubr.msk.bf16.vlgmr.msra.gmra.mrb[0].mxu0 %vm26_vm1, %v31_v7 }
   0xa   :  { %10 = vsyncpa [#allocation4], 0  ;;  %291 = vmatprep.subr.bf16.mxu1 %v350_v1  ;;  %v316_v8 = vld [vmem:[%s449_s3 + $0x10] sm:$0xff]   ;;  %v317_v9 = vld [vmem:[%s449_s3 + $0x18] sm:$0xff]   ;;  %s352_s17 = smov [#allocation3]  }
   0xb   :  { %v318_v10 = vld [vmem:[%s449_s3 + $0x20] sm:$0xff]   ;;  %v319_v11 = vld [vmem:[%s449_s3 + $0x28] sm:$0xff]   ;;  %v320_v12 = vld [vmem:[%s449_s3 + $0x30] sm:$0xff]   ;;  %s243_s18 = sshll.u32 %s352_s17, 4  ;;  %s244_s18 = int_to_ptr.vmem [resolvable:$true] %s243_s18 }
   0xc   :  { %292 = vmatpush3.bf16.msra.mxu1 %v316_v8  ;;  %v321_v13 = vld [vmem:[%s449_s3 + $0x38] sm:$0xff]   ;;  %v254_v14 = vld [vmem:[%s448_s2] ss:$0 sm:$0xff]  ;;  %v111_v34 = vld [vmem:[#allocation2 + $0x8] sm:$0xff]  ;;  %s326_s19 = scalar_lea.vmem %s244_s18, 256  ;;  %p331_p1 = scmp.lt.s32.totalorder %s244_s18, %s244_s18 }
   0xd   :  { %293 = vmatprep.subr.bf16.mxu1 %v350_v1  ;;  %v110_v32 = vld [vmem:[#allocation2] sm:$0xff]  ;;  %p327_p0 = scmp.ne.s32.totalorder %s244_s18, %s326_s19  ;;  %p332_p2 = scmp.lt.s32.totalorder %s326_s19, %s326_s19 }
   0xe   :  { %v266_v40 = vld [vmem:[%s450_s4] ss:$0 sm:$0xff] }
   0xf   :  { %p333_p3 = por %p332_p2, %p331_p1 }
  0x10   :  { %294 = vmatpush3.bf16.msra.mxu1 %v317_v9 }
  0x11   :  { %295 = vmatprep.subr.bf16.mxu1 %v350_v1  ;;  %p334_p4 = pnand %p333_p3, %p327_p0 }
  0x14   :  { %296 = vmatpush3.bf16.msra.mxu1 %v318_v10 }
  0x15   :  { %297 = vmatprep.subr.bf16.mxu1 %v350_v1 }
  0x18   :  { %298 = vmatpush3.bf16.msra.mxu1 %v319_v11 }
  0x19   :  { %299 = vmatprep.subr.bf16.mxu1 %v350_v1 }
  0x1c   :  { %300 = vmatpush3.bf16.msra.mxu1 %v320_v12 }
  0x1d   :  { %301 = vmatprep.subr.bf16.mxu1 %v350_v1 }
  0x20   :  { %302 = vmatpush3.bf16.msra.mxu1 %v321_v13 }
  0xdc   :  { %v93_v15 = vpop.f32.mrb[0].mxu0 }
  0xdd   :  { %v94_v16 = vadd.f32 %v254_v14, %v93_v15  ;;  %v285_v17 = vpop.f32.mrb[1].mxu0 }
  0xde   :  { %v96_v18 = vpop.f32.mrb[2].mxu0 }
  0xdf   :  { %v102_v19 = vmul.f32 0.70710677, %v94_v16  ;;  %v97_v20 = vadd.f32 %v254_v14, %v96_v18  ;;  %v286_v21 = vpop.f32.mrb[3].mxu0  ;;  %v100_v26 = vmul.f32 0.5, %v94_v16 }
  0xe1   :  { %322 = verf.f32 %v102_v19  ;;  %v103_v22 = vmul.f32 0.70710677, %v97_v20  ;;  %v101_v27 = vmul.f32 0.5, %v97_v20 }
  0xe3   :  { %324 = verf.f32 %v103_v22 }
  0xeb   :  { %v323_v23 = vpop.eup %322 }
  0xec   :  { %v106_v24 = vadd.f32 1.0, %v323_v23 }
  0xed   :  { %v325_v25 = vpop.eup %324 }
  0xee   :  { %v107_v28 = vadd.f32 1.0, %v325_v25  ;;  %v108_v29 = vmul.f32 %v106_v24, %v100_v26 }
  0xf0   :  { %v109_v30 = vmul.f32 %v107_v28, %v101_v27 }
  0xf2   :  { %v112_v31 = vpack.c.bf16 %v109_v30, %v108_v29 }
  0xf4   :  { %304 = vmatmul.mubr.bf16.vlgmr.msra.gmra.mrb[0].mxu1 %v112_v31 }
 0x1c7   :  { %v211_v33 = vpop.f32.mrb[0].mxu1 }
 0x1c8   :  { %v218_v35 = vadd.f32 %v211_v33, %v110_v32  ;;  %v305_v36 = vpop.f32.mrb[1].mxu1 }
 0x1c9   :  { %v214_v37 = vpop.f32.mrb[2].mxu1 }
 0x1ca   :  { %220 = vst.msk [vmem:[#allocation2] sm:$0xff] %vm26_vm1, %v218_v35  ;;  %v219_v38 = vadd.f32 %v214_v37, %v111_v34  ;;  %v306_v39 = vpop.f32.mrb[3].mxu1 }
 0x1cc   :  { %221 = vst.msk [vmem:[#allocation2 + $0x8] sm:$0xff] %vm26_vm1, %v219_v38 }
 0x1d1   :  { %v225_v41 = vld [vmem:[#allocation2] sm:$0xff] }
 0x1d2   :  { %v234_v42 = vadd.f32 %v266_v40, %v225_v41 }
 0x1d3   :  { %v226_v43 = vld [vmem:[#allocation2 + $0x8] sm:$0xff] }
 0x1d4   :  { %v235_v44 = vadd.f32 %v266_v40, %v226_v43  ;;  %236 = vst.msk [vmem:[#allocation3] sm:$0xff] %vm26_vm1, %v234_v42 }
 0x1d6   :  { %237 = vst.msk [vmem:[#allocation3 + $0x8] sm:$0xff] %vm26_vm1, %v235_v44 }
 0x1d7   :  { %337 = shalt.err (!%p334_p4)
}
 0x1d8   :  { %s338_s21 = scalar_lea.hbm %s451_s5, 256 }
 0x1d9   :  { %p339_p5 = scmp.ne.s32.totalorder %s451_s5, %s338_s21  ;;  %p342_p6 = scmp.lt.u32.totalorder %s338_s21, %s451_s5 }
 0x1db   :  { %p344_p7 = pnand %p342_p6, %p339_p5 }
 0x1dd   :  { %347 = shalt.err (!%p344_p7)
}
 0x1de   :  { %s353_s26 = smov 128   ;;  %s354_s1 = smov 8  }
 0x1df   :  { %249 = dma.vmem_to_hbm [thread:$0]  %s244_s18, 256, %s451_s5, [#allocation4], %s353_s26, %s353_s26, %s354_s1  }
 0x1e0   :  { %348 = dma.done.wait [#allocation4], 256  }
 0x1e1   :  { %349 = vsyncadd [#allocation4], 4294967040 }
 0x1e2   :  { %253 = vsyncpa [#allocation4], 1 }

</bundles_post_ra>
